<compile_context>
chip_gen: v5e
topology: v5e:2x2
jax: 0.10.0
libtpu: 0.0.40
codegen_flags: <defaults>
</compile_context>

<pallas_src>
import jax
import jax.numpy as jnp
from jax.experimental import pallas as pl
from jax.experimental.pallas import tpu as pltpu


def _round_up(n, m):
    return ((n + m - 1) // m) * m


def mlp_kernel(x_ref, w1_ref, b1_ref, w2_ref, b2_ref, w3_ref, b3_ref, o_ref):
    # x_ref: (8, T) batch-on-lanes tile.
    x = x_ref[...]

    # Layer 1: (6, 8) @ (8, T) + (6, 1) -> ReLU
    h1 = jnp.dot(w1_ref[...], x, preferred_element_type=jnp.float32)
    h1 = jnp.maximum(h1 + b1_ref[...], 0.0)

    # Layer 2: (4, 6) @ (6, T) + (4, 1) -> ReLU
    h2 = jnp.dot(w2_ref[...], h1, preferred_element_type=jnp.float32)
    h2 = jnp.maximum(h2 + b2_ref[...], 0.0)

    # Layer 3: (1, 4) @ (4, T) + (1, 1) -> Sigmoid
    h3 = jnp.dot(w3_ref[...], h2, preferred_element_type=jnp.float32)
    h3 = h3 + b3_ref[...]
    o_ref[...] = jax.nn.sigmoid(h3).astype(o_ref.dtype)


def mlp_forward(x, w1, b1, w2, b2, w3, b3, *, tile=2048):
    """x: (B, 8) float32. Weights PyTorch-style: w (out, in), b (out, 1)."""
    B = x.shape[0]
    # Lane tile: multiple of 128, capped so tiny batches don't over-pad.
    T = min(tile, _round_up(B, 128))
    B_pad = _round_up(B, T)

    # Batch on lanes: pad then transpose to (8, B_pad). Zero padding is
    # harmless (extra columns are dropped after the kernel).
    x_t = jnp.pad(x, ((0, B_pad - B), (0, 0))).T

    grid = (B_pad // T,)

    def const_spec(shape):
        return pl.BlockSpec(shape, lambda i: (0,) * len(shape))

    flops = 2 * B_pad * (8 * 6 + 6 * 4 + 4 * 1)
    bytes_accessed = 4 * (8 * B_pad + B_pad + 6 * 8 + 6 + 4 * 6 + 4 + 4 + 1)

    out = pl.pallas_call(
        mlp_kernel,
        out_shape=jax.ShapeDtypeStruct((1, B_pad), jnp.float32),
        grid=grid,
        in_specs=[
            pl.BlockSpec((8, T), lambda i: (0, i)),   # x tile (pipelined)
            const_spec(w1.shape), const_spec(b1.shape),
            const_spec(w2.shape), const_spec(b2.shape),
            const_spec(w3.shape), const_spec(b3.shape),
        ],
        out_specs=pl.BlockSpec((1, T), lambda i: (0, i)),
        compiler_params=pltpu.CompilerParams(
            dimension_semantics=("parallel",)),
        cost_estimate=pl.CostEstimate(
            flops=flops, transcendentals=B_pad, bytes_accessed=bytes_accessed),
    )(x_t, w1, b1, w2, b2, w3, b3)

    # (1, B_pad) -> (B, 1)
    return out[:, :B].T


def init_params(key):
    # Deterministic init mimicking torch.nn.Linear default
    # (uniform +-1/sqrt(fan_in)); stored as (out, in) / (out, 1).
    def linear(key, fan_in, fan_out):
        kw, kb = jax.random.split(key)
        bound = 1.0 / jnp.sqrt(fan_in)
        w = jax.random.uniform(kw, (fan_out, fan_in), jnp.float32, -bound, bound)
        b = jax.random.uniform(kb, (fan_out, 1), jnp.float32, -bound, bound)
        return w, b

    k1, k2, k3 = jax.random.split(key, 3)
    w1, b1 = linear(k1, 8, 6)
    w2, b2 = linear(k2, 6, 4)
    w3, b3 = linear(k3, 4, 1)
    return w1, b1, w2, b2, w3, b3


def reference_forward(x, w1, b1, w2, b2, w3, b3):
    h1 = jnp.maximum(x @ w1.T + b1.T, 0.0)
    h2 = jnp.maximum(h1 @ w2.T + b2.T, 0.0)
    return jax.nn.sigmoid(h2 @ w3.T + b3.T)


if __name__ == "__main__":
    key = jax.random.PRNGKey(0)
    kx, kp = jax.random.split(key)

    B = 8
    x = jax.random.normal(kx, (B, 8), jnp.float32)
    params = init_params(kp)

    out = mlp_forward(x, *params)
    out = jax.block_until_ready(out)

    ref = reference_forward(x, *params)
    assert out.shape == (B, 1)
    assert jnp.allclose(out, ref, atol=1e-5, rtol=1e-5)

    print("KERNEL_OK")
</pallas_src>

<mosaic_0001>
module attributes {stable_mosaic.version = 11 : i64} {
  func.func @mlp_kernel(%arg0: i32, %arg1: memref<8x128xf32, #tpu.memory_space<vmem>>, %arg2: memref<6x8xf32, #tpu.memory_space<vmem>>, %arg3: memref<6x1xf32, #tpu.memory_space<vmem>>, %arg4: memref<4x6xf32, #tpu.memory_space<vmem>>, %arg5: memref<4x1xf32, #tpu.memory_space<vmem>>, %arg6: memref<1x4xf32, #tpu.memory_space<vmem>>, %arg7: memref<1x1xf32, #tpu.memory_space<vmem>>, %arg8: memref<1x128xf32, #tpu.memory_space<vmem>>) attributes {dimension_semantics = [#tpu.dimension_semantics<parallel>], iteration_bounds = array<i64: 1>, scalar_prefetch = 0 : i64, scratch_operands = 0 : i64, tpu.core_type = #tpu.core_type<tc>, window_params = [{transform_indices = @transform_0, window_bounds = array<i64: 8, 128>}, {pipeline_mode = #tpu.pipeline_mode<synchronous>, transform_indices = @transform_1, window_bounds = array<i64: 6, 8>}, {pipeline_mode = #tpu.pipeline_mode<synchronous>, transform_indices = @transform_2, window_bounds = array<i64: 6, 1>}, {pipeline_mode = #tpu.pipeline_mode<synchronous>, transform_indices = @transform_3, window_bounds = array<i64: 4, 6>}, {pipeline_mode = #tpu.pipeline_mode<synchronous>, transform_indices = @transform_4, window_bounds = array<i64: 4, 1>}, {pipeline_mode = #tpu.pipeline_mode<synchronous>, transform_indices = @transform_5, window_bounds = array<i64: 1, 4>}, {pipeline_mode = #tpu.pipeline_mode<synchronous>, transform_indices = @transform_6, window_bounds = array<i64: 1, 1>}, {transform_indices = @transform_7, window_bounds = array<i64: 1, 128>}]} {
    %c0 = arith.constant 0 : index
    %c0_0 = arith.constant 0 : index
    %0 = vector.load %arg1[%c0, %c0_0] : memref<8x128xf32, #tpu.memory_space<vmem>>, vector<8x128xf32>
    %c0_1 = arith.constant 0 : index
    %c0_2 = arith.constant 0 : index
    %1 = vector.load %arg2[%c0_1, %c0_2] : memref<6x8xf32, #tpu.memory_space<vmem>>, vector<6x8xf32>
    %cst = arith.constant dense<0.000000e+00> : vector<6x128xf32>
    %2 = tpu.matmul %1, %0, %cst {dimension_numbers = #tpu.dot_dimension_numbers<[1], [0], [0], [1], [0, 0, 1, 1], [], []>} : vector<6x8xf32>, vector<8x128xf32>, vector<6x128xf32> -> vector<6x128xf32>
    %c0_3 = arith.constant 0 : index
    %c0_4 = arith.constant 0 : index
    %3 = vector.load %arg3[%c0_3, %c0_4] : memref<6x1xf32, #tpu.memory_space<vmem>>, vector<6x1xf32>
    %4 = vector.broadcast %3 : vector<6x1xf32> to vector<6x128xf32>
    %5 = arith.addf %2, %4 : vector<6x128xf32>
    %cst_5 = arith.constant 0.000000e+00 : f32
    %6 = vector.broadcast %cst_5 : f32 to vector<6x128xf32>
    %7 = arith.maximumf %5, %6 : vector<6x128xf32>
    %c0_6 = arith.constant 0 : index
    %c0_7 = arith.constant 0 : index
    %8 = vector.load %arg4[%c0_6, %c0_7] : memref<4x6xf32, #tpu.memory_space<vmem>>, vector<4x6xf32>
    %cst_8 = arith.constant dense<0.000000e+00> : vector<4x128xf32>
    %9 = tpu.matmul %8, %7, %cst_8 {dimension_numbers = #tpu.dot_dimension_numbers<[1], [0], [0], [1], [0, 0, 1, 1], [], []>} : vector<4x6xf32>, vector<6x128xf32>, vector<4x128xf32> -> vector<4x128xf32>
    %c0_9 = arith.constant 0 : index
    %c0_10 = arith.constant 0 : index
    %10 = vector.load %arg5[%c0_9, %c0_10] : memref<4x1xf32, #tpu.memory_space<vmem>>, vector<4x1xf32>
    %11 = vector.broadcast %10 : vector<4x1xf32> to vector<4x128xf32>
    %12 = arith.addf %9, %11 : vector<4x128xf32>
    %cst_11 = arith.constant 0.000000e+00 : f32
    %13 = vector.broadcast %cst_11 : f32 to vector<4x128xf32>
    %14 = arith.maximumf %12, %13 : vector<4x128xf32>
    %c0_12 = arith.constant 0 : index
    %c0_13 = arith.constant 0 : index
    %15 = vector.load %arg6[%c0_12, %c0_13] : memref<1x4xf32, #tpu.memory_space<vmem>>, vector<1x4xf32>
    %cst_14 = arith.constant dense<0.000000e+00> : vector<1x128xf32>
    %16 = tpu.matmul %15, %14, %cst_14 {dimension_numbers = #tpu.dot_dimension_numbers<[1], [0], [0], [1], [0, 0, 1, 1], [], []>} : vector<1x4xf32>, vector<4x128xf32>, vector<1x128xf32> -> vector<1x128xf32>
    %c0_15 = arith.constant 0 : index
    %c0_16 = arith.constant 0 : index
    %17 = vector.load %arg7[%c0_15, %c0_16] : memref<1x1xf32, #tpu.memory_space<vmem>>, vector<1x1xf32>
    %18 = vector.broadcast %17 : vector<1x1xf32> to vector<1x128xf32>
    %19 = arith.addf %16, %18 : vector<1x128xf32>
    %20 = arith.negf %19 : vector<1x128xf32>
    %21 = math.exp %20 : vector<1x128xf32>
    %cst_17 = arith.constant 1.000000e+00 : f32
    %22 = vector.broadcast %cst_17 : f32 to vector<1x128xf32>
    %23 = arith.addf %22, %21 : vector<1x128xf32>
    %24 = arith.divf %22, %23 : vector<1x128xf32>
    %c0_18 = arith.constant 0 : index
    %c0_19 = arith.constant 0 : index
    %25 = vector.load %arg8[%c0_18, %c0_19] : memref<1x128xf32, #tpu.memory_space<vmem>>, vector<1x128xf32>
    tpu.vector_store %arg8[%c0_18, %c0_19], %24 {strides = array<i32>} : memref<1x128xf32, #tpu.memory_space<vmem>>, vector<1x128xf32>,
    return
  }
  func.func @transform_0(%arg0: i32) -> (i32, i32) {
    %c0_i32 = arith.constant 0 : i32
    %c0_i32_0 = arith.constant 0 : i32
    return %c0_i32, %arg0 : i32, i32
  }
  func.func @transform_1(%arg0: i32) -> (i32, i32) {
    %c0_i32 = arith.constant 0 : i32
    %c0_i32_0 = arith.constant 0 : i32
    %c0_i32_1 = arith.constant 0 : i32
    return %c0_i32, %c0_i32_0 : i32, i32
  }
  func.func @transform_2(%arg0: i32) -> (i32, i32) {
    %c0_i32 = arith.constant 0 : i32
    %c0_i32_0 = arith.constant 0 : i32
    %c0_i32_1 = arith.constant 0 : i32
    return %c0_i32, %c0_i32_0 : i32, i32
  }
  func.func @transform_3(%arg0: i32) -> (i32, i32) {
    %c0_i32 = arith.constant 0 : i32
    %c0_i32_0 = arith.constant 0 : i32
    %c0_i32_1 = arith.constant 0 : i32
    return %c0_i32, %c0_i32_0 : i32, i32
  }
  func.func @transform_4(%arg0: i32) -> (i32, i32) {
    %c0_i32 = arith.constant 0 : i32
    %c0_i32_0 = arith.constant 0 : i32
    %c0_i32_1 = arith.constant 0 : i32
    return %c0_i32, %c0_i32_0 : i32, i32
  }
  func.func @transform_5(%arg0: i32) -> (i32, i32) {
    %c0_i32 = arith.constant 0 : i32
    %c0_i32_0 = arith.constant 0 : i32
    %c0_i32_1 = arith.constant 0 : i32
    return %c0_i32, %c0_i32_0 : i32, i32
  }
  func.func @transform_6(%arg0: i32) -> (i32, i32) {
    %c0_i32 = arith.constant 0 : i32
    %c0_i32_0 = arith.constant 0 : i32
    %c0_i32_1 = arith.constant 0 : i32
    return %c0_i32, %c0_i32_0 : i32, i32
  }
  func.func @transform_7(%arg0: i32) -> (i32, i32) {
    %c0_i32 = arith.constant 0 : i32
    %c0_i32_0 = arith.constant 0 : i32
    return %c0_i32, %arg0 : i32, i32
  }
}

</mosaic_0001>

<bundles_post_ra>
// kernel: tpu_custom_call.1
= control target key start
LH: loop header
LB: loop body
LE: loop exit
PB: predicated region body
PF: predicated region fallthrough
CT: control target
= control target key end

     0   :  { %s319_s0 = inlined_call_operand.vmem [shape: f32[8,128], index: 0, kind: input, shape index: {}]   ;;  %s320_s1 = inlined_call_operand.vmem [shape: f32[6,8], index: 1, kind: input, shape index: {}]   ;;  %s321_s2 = inlined_call_operand.vmem [shape: f32[6,1], index: 2, kind: input, shape index: {}]   ;;  %s322_s3 = inlined_call_operand.hbm [shape: f32[4,6], index: 3, kind: input, shape index: {}]   ;;  %s323_s4 = inlined_call_operand.vmem [shape: f32[4,1], index: 4, kind: input, shape index: {}]   ;;  %s324_s5 = inlined_call_operand.vmem [shape: f32[1,4], index: 5, kind: input, shape index: {}]   ;;  %s325_s6 = inlined_call_operand.<no memory space> [shape: f32[1,1], index: 6, kind: input, shape index: {}]   ;;  %s326_s7 = inlined_call_operand.hbm [shape: f32[1,128], index: 7, kind: output, shape index: {}]  }
   0x1   :  { %v12_v0 = vstv %s325_s6 }
   0x2   :  { %13 = vst [vmem:[#allocation2] sm:$0x1] %v12_v0 }
   0x3   :  { %14 = vsyncpa [#allocation4], 0 }
   0x4   :  { %15 = vsyncpa [#allocation5], 0  ;;  %s27_s28 = sshll.u32 %s322_s3, 4  ;;  %s252_s29 = smov [#allocation3]   ;;  %s28_s28 = int_to_ptr.hbm [resolvable:$true] %s27_s28 }
   0x5   :  { %s29_s30 = sshll.u32 %s252_s29, 4  ;;  %s30_s30 = int_to_ptr.vmem [resolvable:$true] %s29_s30 }
   0x6   :  { %32 = dma.hbm_to_vmem [thread:$0]  %s28_s28, 64, %s30_s30, [#allocation4]  }
   0x7   :  { %248 = dma.done.wait [#allocation4], 64  }
   0x8   :  { %249 = vsyncadd [#allocation4], 4294967232  ;;  %v253_v1 = vmov 0   ;;  %vm51_vm0 = vcmask 64512   ;;  %v43_v2 = vld [vmem:[%s319_s0] sm:$0xff]  ;;  %vm87_vm1 = vcmask 1045504  }
   0x9   :  { %194 = vset.pattern.permute.xlu0 %v253_v1  ;;  %195 = vset.pattern.permute.xlu1 %v253_v1  ;;  %v44_v3 = vld [vmem:[%s320_s1] sm:$0x3f]  ;;  %vm83_vm2 = vcmask 48128   ;;  %vm124_vm3 = vcmask 1043456   ;;  %vm120_vm4 = vcmask 31744   ;;  %s175_s15 = sshll.u32 %s326_s7, 4  ;;  %s176_s15 = int_to_ptr.hbm [resolvable:$true] %s175_s15 }
   0xa   :  { %v45_v4 = vld [vmem:[%s321_s2] sm:$0x3f]  ;;  %70 = vmatpush.msra.mxu0 %v43_v2  ;;  %s254_s2 = smov [#allocation6]  }
   0xb   :  { %48 = vperm.xlu0 %194, %v45_v4   ;;  %185 = vmatmul.msk.f32.vlgmr.msra.gmra.mxu0 %vm51_vm0, %v44_v3  ;;  %v77_v5 = vld [vmem:[%s323_s4] sm:$0xf]  ;;  %s173_s4 = sshll.u32 %s254_s2, 4  ;;  %s174_s4 = int_to_ptr.vmem [resolvable:$true] %s173_s4 }
   0xc   :  { %v76_v10 = vld [vmem:[#allocation3] sm:$0xf]  ;;  %v113_v11 = vld [vmem:[#allocation2] sm:$0x1] }
   0xd   :  { %116 = vperm.xlu1 %195, %v113_v11   ;;  %v112_v16 = vld [vmem:[%s324_s5] sm:$0x1] }
  0x13   :  { %80 = vperm.xlu0 %194, %v77_v5  }
  0x7d   :  { %v49_v6 = vpop.permute.xlu0 %48 }
  0x7f   :  { %v117_v17 = vpop.permute.xlu1 %116 }
  0x80   :  { %v119_v18 = vperm.slane %v117_v17, 0 }
  0x85   :  { %v81_v12 = vpop.permute.xlu0 %80 }
  0x88   :  { %v72_v7 = vpop.f32.mrf.mxu0 }
  0x89   :  { %v73_v8 = vadd.f32 %v72_v7, %v49_v6 }
  0x8b   :  { %v75_v9 = vmax.f32 %v73_v8, 0.0 }
  0x8d   :  { %186 = vmatpush.msk.msra.mxu1 %vm87_vm1, %v75_v9 }
  0x8e   :  { %187 = vmatmul.msk.f32.vlgmr.msra.gmra.mxu1 %vm83_vm2, %v76_v10 }
 0x10b   :  { %v108_v13 = vpop.f32.mrf.mxu1 }
 0x10c   :  { %v109_v14 = vadd.f32 %v108_v13, %v81_v12 }
 0x10e   :  { %v111_v15 = vmax.f32 %v109_v14, 0.0 }
 0x110   :  { %188 = vmatpush.msk.msra.mxu2 %vm124_vm3, %v111_v15 }
 0x111   :  { %189 = vmatmul.msk.f32.vlgmr.msra.gmra.mxu2 %vm120_vm4, %v112_v16 }
 0x194   :  { %v145_v19 = vpop.f32.mrf.mxu2 }
 0x195   :  { %v146_v20 = vadd.f32 %v145_v19, %v119_v18 }
 0x197   :  { %v190_v21 = vmul.f32 -1.442695, %v146_v20 }
 0x199   :  { %196 = vpow2.f32 %v190_v21 }
 0x19f   :  { %v197_v22 = vpop.eup %196 }
 0x1a0   :  { %v151_v23 = vadd.f32 1.0, %v197_v22 }
 0x1a2   :  { %198 = vrcp.f32 %v151_v23  ;;  %v163_v27 = vand.u32 2147483648, %v151_v23  ;;  %v161_v29 = vand.u32 2147483647, %v151_v23  ;;  %vm157_vm6 = vweird.f32 %v151_v23 }
 0x1a4   :  { %v164_v31 = vor.u32 1.1754944e-38, %v163_v27  ;;  %vm162_vm8 = vcmp.eq.f32.partialorder %v161_v29, 8.507059e+37 }
 0x1a8   :  { %v199_v24 = vpop.eup %198 }
 0x1a9   :  { %v153_v25 = vmul.f32 %v199_v24, %v151_v23  ;;  %vm158_vm5 = vweird.f32 %v199_v24 }
 0x1aa   :  { %vm159_vm7 = vmor %vm157_vm6, %vm158_vm5 }
 0x1ab   :  { %v154_v26 = vsub.f32 1.0, %v153_v25 }
 0x1ad   :  { %v155_v28 = vmul.f32 %v199_v24, %v154_v26 }
 0x1af   :  { %v156_v30 = vadd.f32 %v199_v24, %v155_v28 }
 0x1b1   :  { %v160_v32 = vsel %vm159_vm7, %v199_v24, %v156_v30 }
 0x1b2   :  { %v165_v33 = vsel %vm162_vm8, %v164_v31, %v160_v32 }
 0x1b3   :  { %167 = vst [vmem:[#allocation6] sm:$0x1] %v165_v33 }
 0x1b4   :  { %178 = dma.vmem_to_hbm [thread:$0]  %s174_s4, 16, %s176_s15, [#allocation5]  }
 0x1b5   :  { %250 = dma.done.wait [#allocation5], 16  }
 0x1b6   :  { %251 = vsyncadd [#allocation5], 4294967280 }
 0x1b7   :  { %183 = vsyncpa [#allocation4], 1 }
 0x1b8   :  { %184 = vsyncpa [#allocation5], 1 }

</bundles_post_ra>
